<compile_context>
chip_gen: v7x
topology: tpu7x:2x2x1
jax: 0.10.0
libtpu: 0.0.40
codegen_flags: <defaults>
</compile_context>

<pallas_src>
import jax
import jax.numpy as jnp
from jax.experimental import pallas as pl
from jax.experimental.pallas import tpu as pltpu

LANES = 128          # lane-dense feature width (81 features zero-padded to 128)
IN_FEATURES = 9 * 9  # 81


def _linear_kernel(x_ref, w_ref, b_ref, o_ref):
    # x_ref: (1, 128) VMEM — flattened input, zero-padded to a full lane row
    # w_ref: (1, 128) VMEM — weight row, zero-padded to a full lane row
    # b_ref: (1, 1)   SMEM — scalar bias
    # o_ref: (1, 1)   VMEM — scalar output
    acc = jnp.sum(x_ref[...] * w_ref[...], axis=-1, keepdims=True)  # (1, 1)
    o_ref[...] = acc + b_ref[0, 0]


def linear_model_forward(x, weight, bias):
    """Equivalent of LinearModel.forward.

    x      : any shape with 81 total elements (e.g. (9, 9)), float32
    weight : (1, 81) float32  (torch layout: [out_features, in_features])
    bias   : (1,)    float32
    returns: (1,)    float32
    """
    x_flat = jnp.reshape(x, (1, -1))                     # (1, 81), row-major == torch.flatten
    pad = LANES - x_flat.shape[1]
    x_pad = jnp.pad(x_flat, ((0, 0), (0, pad)))          # (1, 128), zeros in padded lanes
    w_pad = jnp.pad(weight, ((0, 0), (0, pad)))          # (1, 128), zeros in padded lanes
    b2d = jnp.reshape(bias, (1, 1))                      # (1, 1) scalar for SMEM

    out = pl.pallas_call(
        _linear_kernel,
        out_shape=jax.ShapeDtypeStruct((1, 1), jnp.float32),
        in_specs=[
            pl.BlockSpec(memory_space=pltpu.MemorySpace.VMEM),   # x (full block)
            pl.BlockSpec(memory_space=pltpu.MemorySpace.VMEM),   # weight (full block)
            pl.BlockSpec(memory_space=pltpu.MemorySpace.SMEM),   # bias (scalar path)
        ],
        out_specs=pl.BlockSpec(memory_space=pltpu.MemorySpace.VMEM),
    )(x_pad, w_pad, b2d)

    return jnp.reshape(out, (1,))  # matches torch output shape (1,)


if __name__ == "__main__":
    key = jax.random.PRNGKey(0)
    k_x, k_w, k_b = jax.random.split(key, 3)

    # Deterministic parameter init mimicking nn.Linear's uniform(-1/sqrt(fan_in), ...)
    fan_in = IN_FEATURES
    bound = 1.0 / (fan_in ** 0.5)
    weight = jax.random.uniform(k_w, (1, fan_in), jnp.float32, -bound, bound)
    bias = jax.random.uniform(k_b, (1,), jnp.float32, -bound, bound)

    # Input: torch.flatten(x) must yield 81 elements -> use shape (9, 9)
    x = jax.random.normal(k_x, (9, 9), jnp.float32)

    out = linear_model_forward(x, weight, bias)
    jax.block_until_ready(out)

    # Reference check in plain JAX
    ref = jnp.dot(weight, jnp.reshape(x, (-1,))) + bias
    assert out.shape == (1,)
    assert jnp.allclose(out, ref, atol=1e-5, rtol=1e-5)

    print("KERNEL_OK")
</pallas_src>

<mosaic_0001>
module attributes {stable_mosaic.version = 11 : i64} {
  func.func @_linear_kernel(%arg0: memref<1x128xf32, #tpu.memory_space<vmem>>, %arg1: memref<1x128xf32, #tpu.memory_space<vmem>>, %arg2: memref<1x1xf32, #tpu.memory_space<smem>>, %arg3: memref<1x1xf32, #tpu.memory_space<vmem>>) attributes {dimension_semantics = [], scalar_prefetch = 0 : i64, scratch_operands = 0 : i64, tpu.core_type = #tpu.core_type<tc>} {
    %c0 = arith.constant 0 : index
    %c0_0 = arith.constant 0 : index
    %0 = vector.load %arg0[%c0, %c0_0] : memref<1x128xf32, #tpu.memory_space<vmem>>, vector<1x128xf32>
    %c0_1 = arith.constant 0 : index
    %c0_2 = arith.constant 0 : index
    %1 = vector.load %arg1[%c0_1, %c0_2] : memref<1x128xf32, #tpu.memory_space<vmem>>, vector<1x128xf32>
    %2 = arith.mulf %0, %1 : vector<1x128xf32>
    %cst = arith.constant dense<0.000000e+00> : vector<1xf32>
    %3 = vector.multi_reduction <add>, %2, %cst [1] : vector<1x128xf32> to vector<1xf32>
    %4 = vector.shape_cast %3 : vector<1xf32> to vector<1x1xf32>
    %c0_3 = arith.constant 0 : index
    %c0_4 = arith.constant 0 : index
    %5 = memref.load %arg2[%c0_3, %c0_4] : memref<1x1xf32, #tpu.memory_space<smem>>
    %6 = vector.broadcast %5 : f32 to vector<1x1xf32>
    %7 = arith.addf %4, %6 : vector<1x1xf32>
    %c0_5 = arith.constant 0 : index
    %c0_6 = arith.constant 0 : index
    %8 = vector.load %arg3[%c0_5, %c0_6] : memref<1x1xf32, #tpu.memory_space<vmem>>, vector<1x1xf32>
    tpu.vector_store %arg3[%c0_5, %c0_6], %7 {strides = array<i32>} : memref<1x1xf32, #tpu.memory_space<vmem>>, vector<1x1xf32>,
    return
  }
}

</mosaic_0001>

<bundles_post_ra>
// kernel: tpu_custom_call.1
= control target key start
LH: loop header
LB: loop body
LE: loop exit
PB: predicated region body
PF: predicated region fallthrough
CT: control target
= control target key end

     0   :  { %vm19_vm0 = vcmask 1040384   ;;  %s109_s0 = inlined_call_operand.vmem [shape: f32[1,128], index: 0, kind: input, shape index: {}]   ;;  %s110_s1 = inlined_call_operand.vmem [shape: f32[1,128], index: 1, kind: input, shape index: {}]   ;;  %s111_s2 = inlined_call_operand.<no memory space> [shape: f32[1,1], index: 2, kind: input, shape index: {}]   ;;  %s112_s3 = inlined_call_operand.hbm [shape: f32[1,1], index: 3, kind: output, shape index: {}]  }
   0x1   :  { %v16_v0 = vld [vmem:[%s109_s0] sm:$0x1] }
   0x2   :  { %v17_v1 = vld [vmem:[%s110_s1] sm:$0x1] }
   0x3   :  { %v18_v2 = vmul.f32 %v17_v1, %v16_v0 }
   0x4   :  { %9 = vsyncpa [#allocation4], 0  ;;  %v24_v4 = vstv %s111_s2  ;;  %s67_s18 = smov [#allocation3]   ;;  %vm26_vm1 = vcmask 0  }
   0x5   :  { %v20_v3 = vsel %vm19_vm0, %v18_v2, 0.0  ;;  %s34_s19 = sshll.u32 %s67_s18, 4  ;;  %s35_s19 = int_to_ptr.vmem [resolvable:$true] %s34_s19 }
   0x6   :  { %21 = vadd.xlane.f32.xlu0 %v20_v3  ;;  %s43_s0 = scalar_lea.vmem %s35_s19, 16  ;;  %s47_s20 = scalar_lea.vmem %s35_s19, 32 }
   0x7   :  { %p44_p0 = scmp.ne.s32.totalorder %s35_s19, %s43_s0  ;;  %p48_p1 = scmp.lt.s32.totalorder %s35_s19, %s35_s19 }
   0x8   :  { %p49_p2 = scmp.lt.s32.totalorder %s47_s20, %s43_s0 }
   0xa   :  { %p50_p3 = por %p49_p2, %p48_p1 }
   0xc   :  { %p51_p4 = pnand %p50_p3, %p44_p0 }
  0x93   :  { %v22_v5 = vpop.xlane.xlu0 %21 }
  0x94   :  { %v25_v6 = vadd.f32 %v24_v4, %v22_v5 }
  0x96   :  { %27 = vst.msk [vmem:[#allocation3] sm:$0x1] %vm26_vm1, %v25_v6 }
  0x97   :  { %54 = shalt.err (!%p51_p4)
}
  0x98   :  { %s55_s22 = scalar_lea.hbm %s112_s3, 16 }
  0x99   :  { %p56_p5 = scmp.ne.s32.totalorder %s112_s3, %s55_s22  ;;  %p59_p6 = scmp.lt.u32.totalorder %s55_s22, %s112_s3 }
  0x9b   :  { %p61_p7 = pnand %p59_p6, %p56_p5 }
  0x9d   :  { %64 = shalt.err (!%p61_p7)
}
  0x9e   :  { %37 = dma.vmem_to_hbm [thread:$0]  %s35_s19, 16, %s112_s3, [#allocation4]  }
  0x9f   :  { %65 = dma.done.wait [#allocation4], 16  }
  0xa0   :  { %66 = vsyncadd [#allocation4], 4294967280 }
  0xa1   :  { %41 = vsyncpa [#allocation4], 1 }

</bundles_post_ra>
